<compile_context>
chip_gen: v6e
topology: v6e:2x2x1
jax: 0.10.0
libtpu: 0.0.40
codegen_flags: <defaults>
</compile_context>

<pallas_src>
import jax
import jax.numpy as jnp
from jax.experimental import pallas as pl
from jax.experimental.pallas import tpu as pltpu

_LAND_LANES = 8  # width of the lane-dense landmark slab (cols 0/1 = x/y)


def _align_output_kernel(out_ref, coef_ref, acted_ref, land_ref):
    """Fused sigmoid + soft-argmax over one (tm, H*W) tile.

    out_ref:   (tm, HW)          raw heatmap logits, one row per (b, n) landmark
    coef_ref:  (2, HW)           row 0 = x (column) coord, row 1 = y (row) coord
    acted_ref: (tm, HW)          sigmoid(out)  -- lane-dense, dominant HBM traffic
    land_ref:  (tm, _LAND_LANES) landmark slab; col 0 = x, col 1 = y, rest zero
    """
    x = out_ref[...].astype(jnp.float32)
    acted = jax.nn.sigmoid(x)                        # EUP, hides under DMA
    acted_ref[...] = acted.astype(acted_ref.dtype)   # unmasked lane-dense vst

    coef = coef_ref[...]                             # (2, HW), resident & tiny
    xcoef = coef[0:1, :]                             # (1, HW)
    ycoef = coef[1:2, :]                             # (1, HW)

    # Exact f32 reductions over the lane axis (per-row, no accumulator needed).
    hsum = jnp.sum(acted, axis=-1, keepdims=True)            # (tm, 1)
    xsum = jnp.sum(acted * xcoef, axis=-1, keepdims=True)    # (tm, 1)
    ysum = jnp.sum(acted * ycoef, axis=-1, keepdims=True)    # (tm, 1)

    inv = 1.0 / jnp.maximum(hsum, 1e-6)                      # clamp(min=1e-6)

    # Tiny secondary output: zero-init the 8-lane slab, then write the two
    # useful columns directly (no iota/where tile construction).
    land_ref[...] = jnp.zeros_like(land_ref)
    land_ref[:, 0:1] = xsum * inv
    land_ref[:, 1:2] = ysum * inv


def _tpu_vmem_bytes():
    """Physical VMEM (per TensorCore); conservative fallback if query fails."""
    try:
        return int(pltpu.get_tpu_info().vmem_capacity_bytes)
    except Exception:
        return 64 << 20  # v7x-safe assumption


def _choose_tile_rows(m, hw, itemsize, target_bytes):
    """Rows per block: ~target bytes of heatmap, dtype-aware rounding,
    and >=2 grid programs when the input is large (v7x megacore)."""
    itemsize = max(int(itemsize), 1)
    row_mult = 8 * max(1, 4 // itemsize)     # 8 f32, 16 bf16/fp16, 32 int8/fp8
    per_row = hw * itemsize
    total = m * per_row

    tm = max(1, target_bytes // per_row)
    if tm >= m:
        # Whole row axis fits in one block.  Split into >=2 programs when
        # there is enough work so both v7x TensorCores get a share.
        if total >= (1 << 20) and m > row_mult:
            half = -(-m // 2)                              # cdiv(m, 2)
            tm = -(-half // row_mult) * row_mult           # round up to mult
            return min(tm, m)
        return m
    tm = max(row_mult, (tm // row_mult) * row_mult)
    return min(tm, m)


def align_output(out, tile_rows=None):
    """Pallas implementation of AlignOutput.forward (heatmap_act='sigmoid')."""
    B, N, H, W = out.shape
    HW = H * W
    M = B * N
    itemsize = int(jnp.dtype(out.dtype).itemsize)

    # Lane-dense layout: the last (lane) axis becomes H*W.
    out_flat = out.reshape(M, HW)

    # Coordinate coefficients for flattened index p = h*W + w (x = p%W, y = p//W).
    p = jnp.arange(HW, dtype=jnp.int32)
    coef = jnp.stack([(p % W).astype(jnp.float32),
                      (p // W).astype(jnp.float32)], axis=0)        # (2, HW)

    # Generation-aware block target / VMEM cap.
    vmem_phys = _tpu_vmem_bytes()
    if vmem_phys >= (100 << 20):          # v5e / v6e: 128 MiB VMEM
        target_bytes = 6 << 20
        limit_cap = 96 << 20
    else:                                 # v7x: 64 MiB per TensorCore
        target_bytes = (5 << 20) // 2     # ~2.5 MiB
        limit_cap = 48 << 20

    if tile_rows is None:
        tm = _choose_tile_rows(M, HW, itemsize, target_bytes)
    else:
        tm = min(int(tile_rows), M)
    grid = (pl.cdiv(M, tm),)

    # VMEM accounting (dtype-aware): double-buffered in/out blocks, resident
    # coefficient block, in-kernel f32 temps, and compiler scratch headroom.
    blk_in = tm * HW * itemsize
    blk_f32 = tm * HW * 4
    land_blk = tm * _LAND_LANES * 4
    vmem_limit = (2 * (2 * blk_in + land_blk)
                  + 2 * (2 * HW * 4)
                  + 3 * blk_f32
                  + (8 << 20))
    vmem_limit = int(min(max(vmem_limit, 16 << 20), limit_cap))

    acted_flat, land_slab = pl.pallas_call(
        _align_output_kernel,
        out_shape=(
            jax.ShapeDtypeStruct((M, HW), out.dtype),
            jax.ShapeDtypeStruct((M, _LAND_LANES), jnp.float32),
        ),
        grid=grid,
        in_specs=[
            pl.BlockSpec((tm, HW), lambda i: (i, 0)),
            pl.BlockSpec((2, HW), lambda i: (0, 0)),    # resident coefficients
        ],
        out_specs=(
            pl.BlockSpec((tm, HW), lambda i: (i, 0)),
            pl.BlockSpec((tm, _LAND_LANES), lambda i: (i, 0)),
        ),
        compiler_params=pltpu.CompilerParams(
            dimension_semantics=("parallel",),
            vmem_limit_bytes=vmem_limit),
    )(out_flat, coef)

    acted = acted_flat.reshape(B, N, H, W)
    # Cast landmark back to the input dtype for output-dtype parity with the
    # PyTorch module (computation itself is exact f32 inside the kernel).
    landmark = land_slab[:, 0:2].reshape(B, N, 2).astype(out.dtype)
    return {"landmark": landmark, "heatmap": out, "heatmap_acted": acted}


def _reference(out):
    # Plain-JAX reference of the PyTorch forward for sanity checking.
    acted = jax.nn.sigmoid(out)
    B, N, H, W = out.shape
    yy = jnp.arange(H, dtype=jnp.float32).reshape(1, 1, H, 1)
    xx = jnp.arange(W, dtype=jnp.float32).reshape(1, 1, 1, W)
    s = jnp.maximum(jnp.sum(acted, axis=(2, 3)), 1e-6)
    xc = jnp.sum(xx * acted, axis=(2, 3)) / s
    yc = jnp.sum(yy * acted, axis=(2, 3)) / s
    landmark = jnp.stack([xc, yc], axis=-1)
    return {"landmark": landmark, "heatmap": out, "heatmap_acted": acted}


def _check(result, ref, out):
    assert jnp.allclose(result["heatmap_acted"], ref["heatmap_acted"],
                        atol=1e-5, rtol=1e-5)
    assert jnp.allclose(result["landmark"], ref["landmark"],
                        atol=1e-4, rtol=1e-4)
    assert jnp.array_equal(result["heatmap"], out)


if __name__ == "__main__":
    # AlignOutput has no learnable parameters; only an input heatmap is needed.
    key = jax.random.PRNGKey(0)

    # Case 1: small canonical shape, single grid step.
    B, N, H, W = 2, 4, 16, 16
    out = jax.random.normal(key, (B, N, H, W), dtype=jnp.float32)
    result = align_output(out)
    jax.block_until_ready(result)
    _check(result, _reference(out), out)

    # Case 2: ragged row count (M = 15, tm = 8) -> 2 grid steps, last partial.
    k2 = jax.random.PRNGKey(1)
    out2 = jax.random.normal(k2, (3, 5, 16, 16), dtype=jnp.float32)
    result2 = align_output(out2, tile_rows=8)
    jax.block_until_ready(result2)
    _check(result2, _reference(out2), out2)

    print("KERNEL_OK")
</pallas_src>

<mosaic_0001>
module attributes {stable_mosaic.version = 11 : i64} {
  func.func @_align_output_kernel(%arg0: i32, %arg1: memref<8x256xf32, #tpu.memory_space<vmem>>, %arg2: memref<2x256xf32, #tpu.memory_space<vmem>>, %arg3: memref<8x256xf32, #tpu.memory_space<vmem>>, %arg4: memref<8x8xf32, #tpu.memory_space<vmem>>) attributes {dimension_semantics = [#tpu.dimension_semantics<parallel>], iteration_bounds = array<i64: 1>, scalar_prefetch = 0 : i64, scratch_operands = 0 : i64, tpu.core_type = #tpu.core_type<tc>, window_params = [{transform_indices = @transform_0, window_bounds = array<i64: 8, 256>}, {pipeline_mode = #tpu.pipeline_mode<synchronous>, transform_indices = @transform_1, window_bounds = array<i64: 2, 256>}, {transform_indices = @transform_2, window_bounds = array<i64: 8, 256>}, {transform_indices = @transform_3, window_bounds = array<i64: 8, 8>}]} {
    %c0 = arith.constant 0 : index
    %c0_0 = arith.constant 0 : index
    %0 = vector.load %arg1[%c0, %c0_0] : memref<8x256xf32, #tpu.memory_space<vmem>>, vector<8x256xf32>
    %1 = arith.negf %0 : vector<8x256xf32>
    %2 = math.exp %1 : vector<8x256xf32>
    %cst = arith.constant 1.000000e+00 : f32
    %3 = vector.broadcast %cst : f32 to vector<8x256xf32>
    %4 = arith.addf %3, %2 : vector<8x256xf32>
    %5 = arith.divf %3, %4 : vector<8x256xf32>
    %c0_1 = arith.constant 0 : index
    %c0_2 = arith.constant 0 : index
    %6 = vector.load %arg3[%c0_1, %c0_2] : memref<8x256xf32, #tpu.memory_space<vmem>>, vector<8x256xf32>
    tpu.vector_store %arg3[%c0_1, %c0_2], %5 {strides = array<i32>} : memref<8x256xf32, #tpu.memory_space<vmem>>, vector<8x256xf32>,
    %c0_3 = arith.constant 0 : index
    %c0_4 = arith.constant 0 : index
    %7 = vector.load %arg2[%c0_3, %c0_4] : memref<2x256xf32, #tpu.memory_space<vmem>>, vector<2x256xf32>
    %8 = vector.extract_strided_slice %7 {offsets = [0, 0], sizes = [1, 256], strides = [1, 1]} : vector<2x256xf32> to vector<1x256xf32>
    %9 = vector.extract_strided_slice %7 {offsets = [1, 0], sizes = [1, 256], strides = [1, 1]} : vector<2x256xf32> to vector<1x256xf32>
    %cst_5 = arith.constant dense<0.000000e+00> : vector<8xf32>
    %10 = vector.multi_reduction <add>, %5, %cst_5 [1] : vector<8x256xf32> to vector<8xf32>
    %11 = vector.shape_cast %10 : vector<8xf32> to vector<8x1xf32>
    %12 = vector.broadcast %8 : vector<1x256xf32> to vector<8x256xf32>
    %13 = arith.mulf %5, %12 : vector<8x256xf32>
    %cst_6 = arith.constant dense<0.000000e+00> : vector<8xf32>
    %14 = vector.multi_reduction <add>, %13, %cst_6 [1] : vector<8x256xf32> to vector<8xf32>
    %15 = vector.shape_cast %14 : vector<8xf32> to vector<8x1xf32>
    %16 = vector.broadcast %9 : vector<1x256xf32> to vector<8x256xf32>
    %17 = arith.mulf %5, %16 : vector<8x256xf32>
    %cst_7 = arith.constant dense<0.000000e+00> : vector<8xf32>
    %18 = vector.multi_reduction <add>, %17, %cst_7 [1] : vector<8x256xf32> to vector<8xf32>
    %19 = vector.shape_cast %18 : vector<8xf32> to vector<8x1xf32>
    %cst_8 = arith.constant 9.99999997E-7 : f32
    %20 = vector.broadcast %cst_8 : f32 to vector<8x1xf32>
    %21 = arith.maximumf %11, %20 : vector<8x1xf32>
    %cst_9 = arith.constant 1.000000e+00 : f32
    %22 = vector.broadcast %cst_9 : f32 to vector<8x1xf32>
    %23 = arith.divf %22, %21 : vector<8x1xf32>
    %cst_10 = arith.constant 0.000000e+00 : f32
    %24 = vector.broadcast %cst_10 : f32 to vector<8x8xf32>
    %c0_11 = arith.constant 0 : index
    %c0_12 = arith.constant 0 : index
    %25 = vector.load %arg4[%c0_11, %c0_12] : memref<8x8xf32, #tpu.memory_space<vmem>>, vector<8x8xf32>
    tpu.vector_store %arg4[%c0_11, %c0_12], %24 {strides = array<i32>} : memref<8x8xf32, #tpu.memory_space<vmem>>, vector<8x8xf32>,
    %26 = arith.mulf %15, %23 : vector<8x1xf32>
    %c0_13 = arith.constant 0 : index
    %c0_14 = arith.constant 0 : index
    %27 = vector.load %arg4[%c0_13, %c0_14] : memref<8x8xf32, #tpu.memory_space<vmem>>, vector<8x1xf32>
    tpu.vector_store %arg4[%c0_13, %c0_14], %26 {strides = array<i32>} : memref<8x8xf32, #tpu.memory_space<vmem>>, vector<8x1xf32>,
    %28 = arith.mulf %19, %23 : vector<8x1xf32>
    %c0_15 = arith.constant 0 : index
    %c1 = arith.constant 1 : index
    %29 = vector.load %arg4[%c0_15, %c1] : memref<8x8xf32, #tpu.memory_space<vmem>>, vector<8x1xf32>
    tpu.vector_store %arg4[%c0_15, %c1], %28 {strides = array<i32>} : memref<8x8xf32, #tpu.memory_space<vmem>>, vector<8x1xf32>,
    return
  }
  func.func @transform_0(%arg0: i32) -> (i32, i32) {
    %c0_i32 = arith.constant 0 : i32
    %c0_i32_0 = arith.constant 0 : i32
    return %arg0, %c0_i32 : i32, i32
  }
  func.func @transform_1(%arg0: i32) -> (i32, i32) {
    %c0_i32 = arith.constant 0 : i32
    %c0_i32_0 = arith.constant 0 : i32
    %c0_i32_1 = arith.constant 0 : i32
    return %c0_i32, %c0_i32_0 : i32, i32
  }
  func.func @transform_2(%arg0: i32) -> (i32, i32) {
    %c0_i32 = arith.constant 0 : i32
    %c0_i32_0 = arith.constant 0 : i32
    return %arg0, %c0_i32 : i32, i32
  }
  func.func @transform_3(%arg0: i32) -> (i32, i32) {
    %c0_i32 = arith.constant 0 : i32
    %c0_i32_0 = arith.constant 0 : i32
    return %arg0, %c0_i32 : i32, i32
  }
}

</mosaic_0001>

<bundles_post_ra>
// kernel: tpu_custom_call.1
= control target key start
LH: loop header
LB: loop body
LE: loop exit
PB: predicated region body
PF: predicated region fallthrough
CT: control target
= control target key end

     0   :  { %9 = vsyncpa [#allocation3], 0  ;;  %s289_s0 = inlined_call_operand.hbm [shape: f32[8,256], index: 0, kind: input, shape index: {}]   ;;  %s290_s1 = inlined_call_operand.hbm [shape: f32[2,256], index: 1, kind: input, shape index: {}]   ;;  %s291_s2 = inlined_call_operand.hbm [shape: f32[8,256], index: 2, kind: output, shape index: {0}]   ;;  %s292_s3 = inlined_call_operand.hbm [shape: f32[8,8], index: 3, kind: output, shape index: {1}]  }
   0x1   :  { %10 = vsyncpa [#allocation6], 0 }
   0x2   :  { %11 = vsyncpa [#allocation4], 0 }
   0x3   :  { %12 = vsyncpa [#allocation9], 0  ;;  %s252_s12 = smov [#allocation2]   ;;  %s253_s14 = smov [#allocation5]  }
   0x4   :  { %s19_s13 = sshll.u32 %s252_s12, 4  ;;  %s29_s15 = sshll.u32 %s253_s14, 4  ;;  %s20_s13 = int_to_ptr.vmem [resolvable:$true] %s19_s13  ;;  %s30_s15 = int_to_ptr.vmem [resolvable:$true] %s29_s15 }
   0x5   :  { %s172_s16 = scalar_lea.vmem %s20_s13, 256  ;;  %p177_p1 = scmp.lt.s32.totalorder %s20_s13, %s20_s13 }
   0x6   :  { %p173_p0 = scmp.ne.s32.totalorder %s20_s13, %s172_s16  ;;  %p178_p2 = scmp.lt.s32.totalorder %s172_s16, %s172_s16 }
   0x8   :  { %p179_p3 = por %p178_p2, %p177_p1 }
   0xa   :  { %p180_p4 = pnand %p179_p3, %p173_p0 }
   0xc   :  { %183 = shalt.err (!%p180_p4)
}
   0xd   :  { %22 = dma.hbm_to_vmem [thread:$0]  %s289_s0, 256, %s20_s13, [#allocation3]  }
   0xe   :  { %s192_s19 = scalar_lea.vmem %s30_s15, 64  ;;  %p197_p6 = scmp.lt.s32.totalorder %s30_s15, %s30_s15 }
   0xf   :  { %p193_p5 = scmp.ne.s32.totalorder %s30_s15, %s192_s19  ;;  %p198_p7 = scmp.lt.s32.totalorder %s192_s19, %s192_s19 }
  0x11   :  { %p199_p8 = por %p198_p7, %p197_p6 }
  0x13   :  { %p200_p9 = pnand %p199_p8, %p193_p5 }
  0x15   :  { %203 = shalt.err (!%p200_p9)
}
  0x16   :  { %32 = dma.hbm_to_vmem [thread:$0]  %s290_s1, 64, %s30_s15, [#allocation6]  }
  0x17   :  { %244 = dma.done.wait [#allocation3], 256  }
  0x18   :  { %245 = vsyncadd [#allocation3], 4294967040 }
  0x19   :  { %246 = dma.done.wait [#allocation6], 64  }
  0x1a   :  { %247 = vsyncadd [#allocation6], 4294967232  ;;  %v39_v0 = vld [vmem:[#allocation2] sm:$0xff]  ;;  %v40_v1 = vld [vmem:[#allocation2 + $0x8] sm:$0xff]  ;;  %v60_v4 = vlaneseq  ;;  %vm109_vm0 = vcmask 64512   ;;  %s254_s0 = smov [#allocation7]  }
  0x1b   :  { %v147_v2 = vmul.f32 -1.442695, %v39_v0  ;;  %v148_v3 = vmul.f32 -1.442695, %v40_v1  ;;  %v55_v12 = vld [vmem:[#allocation5] sm:$0xf] }
  0x1c   :  { %v61_v8 = vshrl.u32 %v60_v4, 7  ;;  %s123_s1 = sshll.u32 %s254_s0, 4  ;;  %v255_v32 = vmov 0.0   ;;  %s124_s1 = int_to_ptr.vmem [resolvable:$true] %s123_s1 }
  0x1d   :  { %154 = vpow2.f32 %v147_v2  ;;  %110 = vst.msk [vmem:[#allocation8] sm:$0xff] %vm109_vm0, %v255_v32  ;;  %s204_s22 = scalar_lea.vmem %s124_s1, 256  ;;  %p209_p11 = scmp.lt.s32.totalorder %s124_s1, %s124_s1 }
  0x1e   :  { %156 = vpow2.f32 %v148_v3  ;;  %v85_v10 = vsub.s32 1, %v61_v8  ;;  %v62_v11 = vsub.s32 0, %v61_v8  ;;  %v89_v13 = vsub.s32 3, %v61_v8  ;;  %p205_p10 = scmp.ne.s32.totalorder %s124_s1, %s204_s22  ;;  %p210_p12 = scmp.lt.s32.totalorder %s204_s22, %s204_s22 }
  0x1f   :  { %v66_v14 = vsub.s32 2, %v61_v8 }
  0x20   :  { %v86_v15 = vrot.slane %v55_v12, %v85_v10  ;;  %v63_v16 = vrot.slane %v55_v12, %v62_v11  ;;  %v90_v17 = vrot.slane %v55_v12, %v89_v13  ;;  %p211_p13 = por %p210_p12, %p209_p11 }
  0x21   :  { %v67_v18 = vrot.slane %v55_v12, %v66_v14 }
  0x22   :  { %v96_v19 = vrot.slane %v86_v15, %v85_v10  ;;  %v73_v20 = vrot.slane %v63_v16, %v62_v11  ;;  %v100_v21 = vrot.slane %v90_v17, %v85_v10  ;;  %p212_p0 = pnand %p211_p13, %p205_p10 }
  0x23   :  { %v77_v22 = vrot.slane %v67_v18, %v62_v11 }
  0x2a   :  { %v155_v5 = vpop.eup %154 }
  0x2b   :  { %v157_v6 = vpop.eup %156  ;;  %v47_v7 = vadd.f32 1.0, %v155_v5 }
  0x2c   :  { %v48_v9 = vadd.f32 1.0, %v157_v6 }
  0x2d   :  { %158 = vrcp.f32 %v47_v7 }
  0x2e   :  { %160 = vrcp.f32 %v48_v9 }
  0x3a   :  { %v159_v23 = vpop.eup %158 }
  0x3b   :  { %v161_v24 = vpop.eup %160  ;;  %53 = vst [vmem:[#allocation7] sm:$0xff] %v159_v23  ;;  %v101_v25 = vmul.f32 %v159_v23, %v96_v19  ;;  %v78_v26 = vmul.f32 %v159_v23, %v73_v20 }
  0x3c   :  { %v56_v27 = vadd.f32 %v161_v24, %v159_v23  ;;  %54 = vst [vmem:[#allocation7 + $0x8] sm:$0xff] %v161_v24  ;;  %v102_v28 = vmul.f32 %v161_v24, %v100_v21  ;;  %v79_v29 = vmul.f32 %v161_v24, %v77_v22 }
  0x3e   :  { %57 = vadd.xlane.f32.xlu0 %v56_v27  ;;  %v103_v30 = vadd.f32 %v102_v28, %v101_v25  ;;  %v80_v31 = vadd.f32 %v79_v29, %v78_v26 }
  0x40   :  { %104 = vadd.xlane.f32.xlu1 %v103_v30 }
  0x42   :  { %81 = vadd.xlane.f32.xlu0 %v80_v31 }
  0x43   :  { %215 = shalt.err (!%p212_p0)
}
  0x44   :  { %126 = dma.vmem_to_hbm [thread:$0]  %s124_s1, 256, %s291_s2, [#allocation4]   ;;  %vm112_vm1 = vcmask 7168   ;;  %vm115_vm2 = vcmask 15368  }
  0x45   :  { %s256_s25 = smov [#allocation8]  }
  0x46   :  { %s133_s26 = sshll.u32 %s256_s25, 4  ;;  %s134_s26 = int_to_ptr.vmem [resolvable:$true] %s133_s26 }
  0x47   :  { %s224_s27 = scalar_lea.vmem %s134_s26, 128  ;;  %p229_p2 = scmp.lt.s32.totalorder %s134_s26, %s134_s26 }
  0x48   :  { %p225_p1 = scmp.ne.s32.totalorder %s134_s26, %s224_s27  ;;  %p230_p3 = scmp.lt.s32.totalorder %s224_s27, %s224_s27 }
  0x4a   :  { %p231_p4 = por %p230_p3, %p229_p2 }
  0x4c   :  { %p232_p5 = pnand %p231_p4, %p225_p1 }
  0xc7   :  { %v58_v33 = vpop.xlane.xlu0 %57 }
  0xc8   :  { %v106_v34 = vmax.f32 %v58_v33, 1e-06 }
  0xc9   :  { %v105_v35 = vpop.xlane.xlu1 %104 }
  0xca   :  { %162 = vrcp.f32 %v106_v34 }
  0xcb   :  { %v82_v36 = vpop.xlane.xlu0 %81 }
  0xd7   :  { %v163_v37 = vpop.eup %162 }
  0xd8   :  { %v114_v38 = vmul.f32 %v163_v37, %v105_v35  ;;  %v111_v39 = vmul.f32 %v163_v37, %v82_v36 }
  0xda   :  { %113 = vst.msk [vmem:[#allocation8] sm:$0xff] %vm112_vm1, %v111_v39 }
  0xdb   :  { %116 = vst.msk [vmem:[#allocation8] sm:$0xff] %vm115_vm2, %v114_v38 }
  0xdc   :  { %235 = shalt.err (!%p232_p5)
}
  0xdd   :  { %136 = dma.vmem_to_hbm [thread:$0]  %s134_s26, 128, %s292_s3, [#allocation9]  }
  0xde   :  { %248 = dma.done.wait [#allocation4], 256  }
  0xdf   :  { %249 = vsyncadd [#allocation4], 4294967040 }
  0xe0   :  { %250 = dma.done.wait [#allocation9], 128  }
  0xe1   :  { %251 = vsyncadd [#allocation9], 4294967168 }
  0xe2   :  { %143 = vsyncpa [#allocation3], 1 }
  0xe3   :  { %144 = vsyncpa [#allocation6], 1 }
  0xe4   :  { %145 = vsyncpa [#allocation4], 1 }
  0xe5   :  { %146 = vsyncpa [#allocation9], 1 }

</bundles_post_ra>
